<compile_context>
chip_gen: v6e
topology: v6e:2x2x1
jax: 0.10.0
libtpu: 0.0.40
codegen_flags: <defaults>
</compile_context>

<pallas_src>
import functools
import math

import jax
import jax.numpy as jnp
from jax.experimental import pallas as pl
from jax.experimental.pallas import tpu as pltpu

LN_EPS = 1e-12


def _round_up(n, m):
    return ((n + m - 1) // m) * m


def _erf_poly(x):
    # Abramowitz & Stegun 7.1.26, max abs error ~1.5e-7 (negligible vs bf16 inputs).
    p = 0.3275911
    a1, a2, a3, a4, a5 = (0.254829592, -0.284496736, 1.421413741,
                          -1.453152027, 1.061405429)
    ax = jnp.abs(x)
    t = 1.0 / (1.0 + p * ax)
    poly = t * (a1 + t * (a2 + t * (a3 + t * (a4 + t * a5))))
    y = 1.0 - poly * jnp.exp(-(ax * ax))
    return jnp.where(x >= 0.0, y, -y)


def _gelu_exact(x):
    # F.gelu default: 0.5 * x * (1 + erf(x / sqrt(2)))
    return 0.5 * x * (1.0 + _erf_poly(x * (1.0 / math.sqrt(2.0))))


# --------------------------------- fused MLM-head kernel -----------------------------
def _mlm_head_kernel(x_ref, w1_ref, b1_ref, g_ref, beta_ref, w2_ref, b2_ref,
                     o_ref, h_ref, *, eps):
    # Phase 1 — once per row tile (inner vocab axis index j == 0):
    #   linear1 -> exact GELU -> LayerNorm, kept resident in a bf16 VMEM scratch.
    @pl.when(pl.program_id(1) == 0)
    def _():
        h = jnp.dot(x_ref[...], w1_ref[...],
                    preferred_element_type=jnp.float32)          # bf16 x bf16 -> f32
        h = h + b1_ref[...]                                      # (1, D) f32 bias
        h = _gelu_exact(h)                                       # exact erf-GELU
        mu = jnp.mean(h, axis=-1, keepdims=True)                 # LN stats in f32
        var = jnp.mean((h - mu) ** 2, axis=-1, keepdims=True)
        h = (h - mu) * jax.lax.rsqrt(var + eps)
        h = h * g_ref[...] + beta_ref[...]
        h_ref[...] = h.astype(h_ref.dtype)                       # bf16 for 2nd matmul

    # Phase 2 — every (i, j): one lane-dense vocab tile of linear2.
    logits = jnp.dot(h_ref[...], w2_ref[...],
                     preferred_element_type=jnp.float32)
    o_ref[...] = (logits + b2_ref[...]).astype(o_ref.dtype)


def bert_mlm_head(x, params, *, row_tile=256, vocab_tile=512):
    """x: (B, S, D) float32/bf16; returns (B, S, V) float32 logits."""
    B, S, D = x.shape
    w1, b1 = params['w1'], params['b1']          # (D, D) bf16, (1, D) f32
    g, beta = params['ln_g'], params['ln_b']     # (1, D) f32
    w2, b2 = params['w2'], params['b2']          # (D, V) bf16, (1, V) f32
    V = w2.shape[1]

    N = B * S
    xf = x.reshape(N, D).astype(jnp.bfloat16)

    # Row tile: multiple of 16 (bf16 sublane packing); pad N up to a tile multiple.
    tn = min(row_tile, _round_up(N, 16))
    Np = _round_up(N, tn)
    if Np != N:
        xf = jnp.pad(xf, ((0, Np - N), (0, 0)))

    # Vocab tile: multiple of 128 (lane-dense, unmasked stores); pad W2/b2.
    tv = min(vocab_tile, _round_up(V, 128))
    Vp = _round_up(V, tv)
    if Vp != V:
        w2 = jnp.pad(w2, ((0, 0), (0, Vp - V)))
        b2 = jnp.pad(b2, ((0, 0), (0, Vp - V)))

    grid = (Np // tn, Vp // tv)
    out = pl.pallas_call(
        functools.partial(_mlm_head_kernel, eps=LN_EPS),
        out_shape=jax.ShapeDtypeStruct((Np, Vp), jnp.float32),
        grid=grid,
        in_specs=[
            pl.BlockSpec((tn, D), lambda i, j: (i, 0)),    # x rows (constant over j)
            pl.BlockSpec((D, D), lambda i, j: (0, 0)),     # w1 (resident)
            pl.BlockSpec((1, D), lambda i, j: (0, 0)),     # b1
            pl.BlockSpec((1, D), lambda i, j: (0, 0)),     # ln gamma
            pl.BlockSpec((1, D), lambda i, j: (0, 0)),     # ln beta
            pl.BlockSpec((D, tv), lambda i, j: (0, j)),    # streamed w2 column tile
            pl.BlockSpec((1, tv), lambda i, j: (0, j)),    # streamed b2 tile
        ],
        out_specs=pl.BlockSpec((tn, tv), lambda i, j: (i, j)),
        scratch_shapes=[pltpu.VMEM((tn, D), jnp.bfloat16)],   # LN(GELU(linear1)) cache
        compiler_params=pltpu.CompilerParams(
            dimension_semantics=("parallel", "arbitrary"),
            vmem_limit_bytes=64 * 1024 * 1024),
    )(xf, w1, b1, g, beta, w2, b2)

    return out[:N, :V].reshape(B, S, V)


# ------------------------------------ init / reference -------------------------------
def init_params(key, D, V):
    ks = jax.random.split(key, 6)

    def norm(k, shape, scale=0.02, dtype=jnp.float32):
        return (scale * jax.random.normal(k, shape)).astype(dtype)

    return {
        'w1': norm(ks[0], (D, D), dtype=jnp.bfloat16),
        'b1': norm(ks[1], (1, D)),
        'ln_g': (1.0 + 0.02 * jax.random.normal(ks[2], (1, D))).astype(jnp.float32),
        'ln_b': norm(ks[3], (1, D)),
        'w2': norm(ks[4], (D, V), dtype=jnp.bfloat16),
        'b2': norm(ks[5], (1, V)),
    }


def reference_forward(x, params):
    """Pure-JAX reference with the same dtype policy (bf16 matmuls, f32 accum/LN)."""
    xb = x.astype(jnp.bfloat16)
    h = jnp.dot(xb, params['w1'], preferred_element_type=jnp.float32) + params['b1'][0]
    h = jax.nn.gelu(h, approximate=False)          # exact erf-GELU (XLA erf)
    mu = h.mean(-1, keepdims=True)
    var = ((h - mu) ** 2).mean(-1, keepdims=True)
    h = (h - mu) / jnp.sqrt(var + LN_EPS) * params['ln_g'][0] + params['ln_b'][0]
    h = h.astype(jnp.bfloat16)
    return jnp.dot(h, params['w2'], preferred_element_type=jnp.float32) + params['b2'][0]


if __name__ == "__main__":
    # Small shapes consistent with the module: batch=2, seq=8, emb_dim=128, vocab=256.
    B, S, D, V = 2, 8, 128, 256

    key = jax.random.PRNGKey(0)
    pkey, xkey = jax.random.split(key)
    params = init_params(pkey, D, V)
    x = jax.random.normal(xkey, (B, S, D), jnp.float32)

    out = bert_mlm_head(x, params)
    out = jax.block_until_ready(out)
    assert out.shape == (B, S, V)
    assert not bool(jnp.any(jnp.isnan(out)))

    ref = reference_forward(x, params)
    max_err = float(jnp.max(jnp.abs(out - ref)))
    assert bool(jnp.allclose(out, ref, atol=2e-2, rtol=2e-2)), max_err

    print("KERNEL_OK")
</pallas_src>

<mosaic_0001>
module attributes {stable_mosaic.version = 11 : i64} {
  func.func @_mlm_head_kernel(%arg0: i32, %arg1: i32, %arg2: memref<16x128xbf16, #tpu.memory_space<vmem>>, %arg3: memref<128x128xbf16, #tpu.memory_space<vmem>>, %arg4: memref<1x128xf32, #tpu.memory_space<vmem>>, %arg5: memref<1x128xf32, #tpu.memory_space<vmem>>, %arg6: memref<1x128xf32, #tpu.memory_space<vmem>>, %arg7: memref<128x256xbf16, #tpu.memory_space<vmem>>, %arg8: memref<1x256xf32, #tpu.memory_space<vmem>>, %arg9: memref<16x256xf32, #tpu.memory_space<vmem>>, %arg10: memref<16x128xbf16, #tpu.memory_space<vmem>>) attributes {dimension_semantics = [#tpu.dimension_semantics<parallel>, #tpu.dimension_semantics<arbitrary>], iteration_bounds = array<i64: 1, 1>, scalar_prefetch = 0 : i64, scratch_operands = 1 : i64, tpu.core_type = #tpu.core_type<tc>, window_params = [{transform_indices = @transform_0, window_bounds = array<i64: 16, 128>}, {pipeline_mode = #tpu.pipeline_mode<synchronous>, transform_indices = @transform_1, window_bounds = array<i64: 128, 128>}, {pipeline_mode = #tpu.pipeline_mode<synchronous>, transform_indices = @transform_2, window_bounds = array<i64: 1, 128>}, {pipeline_mode = #tpu.pipeline_mode<synchronous>, transform_indices = @transform_3, window_bounds = array<i64: 1, 128>}, {pipeline_mode = #tpu.pipeline_mode<synchronous>, transform_indices = @transform_4, window_bounds = array<i64: 1, 128>}, {transform_indices = @transform_5, window_bounds = array<i64: 128, 256>}, {transform_indices = @transform_6, window_bounds = array<i64: 1, 256>}, {transform_indices = @transform_7, window_bounds = array<i64: 16, 256>}]} {
    %c0_i32 = arith.constant 0 : i32
    %0 = arith.cmpi eq, %arg1, %c0_i32 : i32
    %1 = arith.extui %0 : i1 to i32
    %c0_i32_0 = arith.constant 0 : i32
    %2 = arith.cmpi ne, %1, %c0_i32_0 : i32
    scf.if %2 {
      %c0_8 = arith.constant 0 : index
      %c0_9 = arith.constant 0 : index
      %10 = vector.load %arg2[%c0_8, %c0_9] : memref<16x128xbf16, #tpu.memory_space<vmem>>, vector<16x128xbf16>
      %c0_10 = arith.constant 0 : index
      %c0_11 = arith.constant 0 : index
      %11 = vector.load %arg3[%c0_10, %c0_11] : memref<128x128xbf16, #tpu.memory_space<vmem>>, vector<128x128xbf16>
      %cst_12 = arith.constant dense<0.000000e+00> : vector<16x128xf32>
      %12 = tpu.matmul %10, %11, %cst_12 {dimension_numbers = #tpu.dot_dimension_numbers<[1], [0], [0], [1], [0, 0, 1, 1], [], []>} : vector<16x128xbf16>, vector<128x128xbf16>, vector<16x128xf32> -> vector<16x128xf32>
      %c0_13 = arith.constant 0 : index
      %c0_14 = arith.constant 0 : index
      %13 = vector.load %arg4[%c0_13, %c0_14] : memref<1x128xf32, #tpu.memory_space<vmem>>, vector<1x128xf32>
      %14 = vector.broadcast %13 : vector<1x128xf32> to vector<16x128xf32>
      %15 = arith.addf %12, %14 : vector<16x128xf32>
      %cst_15 = arith.constant 5.000000e-01 : f32
      %16 = vector.broadcast %cst_15 : f32 to vector<16x128xf32>
      %17 = arith.mulf %16, %15 : vector<16x128xf32>
      %cst_16 = arith.constant 0.707106769 : f32
      %18 = vector.broadcast %cst_16 : f32 to vector<16x128xf32>
      %19 = arith.mulf %15, %18 : vector<16x128xf32>
      %20 = math.absf %19 : vector<16x128xf32>
      %cst_17 = arith.constant 0.327591091 : f32
      %21 = vector.broadcast %cst_17 : f32 to vector<16x128xf32>
      %22 = arith.mulf %21, %20 : vector<16x128xf32>
      %cst_18 = arith.constant 1.000000e+00 : f32
      %23 = vector.broadcast %cst_18 : f32 to vector<16x128xf32>
      %24 = arith.addf %23, %22 : vector<16x128xf32>
      %cst_19 = arith.constant 1.000000e+00 : f32
      %25 = vector.broadcast %cst_19 : f32 to vector<16x128xf32>
      %26 = arith.divf %25, %24 : vector<16x128xf32>
      %cst_20 = arith.constant 1.06140542 : f32
      %27 = vector.broadcast %cst_20 : f32 to vector<16x128xf32>
      %28 = arith.mulf %26, %27 : vector<16x128xf32>
      %cst_21 = arith.constant -1.45315206 : f32
      %29 = vector.broadcast %cst_21 : f32 to vector<16x128xf32>
      %30 = arith.addf %29, %28 : vector<16x128xf32>
      %31 = arith.mulf %26, %30 : vector<16x128xf32>
      %cst_22 = arith.constant 1.42141378 : f32
      %32 = vector.broadcast %cst_22 : f32 to vector<16x128xf32>
      %33 = arith.addf %32, %31 : vector<16x128xf32>
      %34 = arith.mulf %26, %33 : vector<16x128xf32>
      %cst_23 = arith.constant -0.284496725 : f32
      %35 = vector.broadcast %cst_23 : f32 to vector<16x128xf32>
      %36 = arith.addf %35, %34 : vector<16x128xf32>
      %37 = arith.mulf %26, %36 : vector<16x128xf32>
      %cst_24 = arith.constant 0.254829586 : f32
      %38 = vector.broadcast %cst_24 : f32 to vector<16x128xf32>
      %39 = arith.addf %38, %37 : vector<16x128xf32>
      %40 = arith.mulf %26, %39 : vector<16x128xf32>
      %41 = arith.mulf %20, %20 : vector<16x128xf32>
      %cst_25 = arith.constant 0.000000e+00 : f32
      %42 = vector.broadcast %cst_25 : f32 to vector<16x128xf32>
      %43 = arith.subf %42, %41 : vector<16x128xf32>
      %44 = math.exp %43 : vector<16x128xf32>
      %45 = arith.mulf %40, %44 : vector<16x128xf32>
      %cst_26 = arith.constant 1.000000e+00 : f32
      %46 = vector.broadcast %cst_26 : f32 to vector<16x128xf32>
      %47 = arith.subf %46, %45 : vector<16x128xf32>
      %cst_27 = arith.constant 0.000000e+00 : f32
      %48 = vector.broadcast %cst_27 : f32 to vector<16x128xf32>
      %49 = arith.cmpf oge, %19, %48 : vector<16x128xf32>
      %cst_28 = arith.constant 0.000000e+00 : f32
      %50 = vector.broadcast %cst_28 : f32 to vector<16x128xf32>
      %51 = arith.subf %50, %47 : vector<16x128xf32>
      %52 = arith.select %49, %47, %51 : vector<16x128xi1>, vector<16x128xf32>
      %cst_29 = arith.constant 1.000000e+00 : f32
      %53 = vector.broadcast %cst_29 : f32 to vector<16x128xf32>
      %54 = arith.addf %53, %52 : vector<16x128xf32>
      %55 = arith.mulf %17, %54 : vector<16x128xf32>
      %cst_30 = arith.constant dense<0.000000e+00> : vector<16xf32>
      %56 = vector.multi_reduction <add>, %55, %cst_30 [1] : vector<16x128xf32> to vector<16xf32>
      %57 = vector.shape_cast %56 : vector<16xf32> to vector<16x1xf32>
      %cst_31 = arith.constant 1.280000e+02 : f32
      %58 = vector.broadcast %cst_31 : f32 to vector<16x1xf32>
      %59 = arith.divf %57, %58 : vector<16x1xf32>
      %60 = vector.broadcast %59 : vector<16x1xf32> to vector<16x128xf32>
      %61 = arith.subf %55, %60 : vector<16x128xf32>
      %62 = arith.mulf %61, %61 : vector<16x128xf32>
      %cst_32 = arith.constant dense<0.000000e+00> : vector<16xf32>
      %63 = vector.multi_reduction <add>, %62, %cst_32 [1] : vector<16x128xf32> to vector<16xf32>
      %64 = vector.shape_cast %63 : vector<16xf32> to vector<16x1xf32>
      %cst_33 = arith.constant 1.280000e+02 : f32
      %65 = vector.broadcast %cst_33 : f32 to vector<16x1xf32>
      %66 = arith.divf %64, %65 : vector<16x1xf32>
      %67 = vector.broadcast %59 : vector<16x1xf32> to vector<16x128xf32>
      %68 = arith.subf %55, %67 : vector<16x128xf32>
      %cst_34 = arith.constant 9.99999996E-13 : f32
      %69 = vector.broadcast %cst_34 : f32 to vector<16x1xf32>
      %70 = arith.addf %66, %69 : vector<16x1xf32>
      %71 = math.rsqrt %70 : vector<16x1xf32>
      %72 = vector.broadcast %71 : vector<16x1xf32> to vector<16x128xf32>
      %73 = arith.mulf %68, %72 : vector<16x128xf32>
      %c0_35 = arith.constant 0 : index
      %c0_36 = arith.constant 0 : index
      %74 = vector.load %arg5[%c0_35, %c0_36] : memref<1x128xf32, #tpu.memory_space<vmem>>, vector<1x128xf32>
      %75 = vector.broadcast %74 : vector<1x128xf32> to vector<16x128xf32>
      %76 = arith.mulf %73, %75 : vector<16x128xf32>
      %c0_37 = arith.constant 0 : index
      %c0_38 = arith.constant 0 : index
      %77 = vector.load %arg6[%c0_37, %c0_38] : memref<1x128xf32, #tpu.memory_space<vmem>>, vector<1x128xf32>
      %78 = vector.broadcast %77 : vector<1x128xf32> to vector<16x128xf32>
      %79 = arith.addf %76, %78 : vector<16x128xf32>
      %80 = arith.truncf %79 : vector<16x128xf32> to vector<16x128xbf16>
      %c0_39 = arith.constant 0 : index
      %c0_40 = arith.constant 0 : index
      %81 = vector.load %arg10[%c0_39, %c0_40] : memref<16x128xbf16, #tpu.memory_space<vmem>>, vector<16x128xbf16>
      tpu.vector_store %arg10[%c0_39, %c0_40], %80 {strides = array<i32>} : memref<16x128xbf16, #tpu.memory_space<vmem>>, vector<16x128xbf16>,
    } else {
    }
    %c0 = arith.constant 0 : index
    %c0_1 = arith.constant 0 : index
    %3 = vector.load %arg10[%c0, %c0_1] : memref<16x128xbf16, #tpu.memory_space<vmem>>, vector<16x128xbf16>
    %c0_2 = arith.constant 0 : index
    %c0_3 = arith.constant 0 : index
    %4 = vector.load %arg7[%c0_2, %c0_3] : memref<128x256xbf16, #tpu.memory_space<vmem>>, vector<128x256xbf16>
    %cst = arith.constant dense<0.000000e+00> : vector<16x256xf32>
    %5 = tpu.matmul %3, %4, %cst {dimension_numbers = #tpu.dot_dimension_numbers<[1], [0], [0], [1], [0, 0, 1, 1], [], []>} : vector<16x128xbf16>, vector<128x256xbf16>, vector<16x256xf32> -> vector<16x256xf32>
    %c0_4 = arith.constant 0 : index
    %c0_5 = arith.constant 0 : index
    %6 = vector.load %arg8[%c0_4, %c0_5] : memref<1x256xf32, #tpu.memory_space<vmem>>, vector<1x256xf32>
    %7 = vector.broadcast %6 : vector<1x256xf32> to vector<16x256xf32>
    %8 = arith.addf %5, %7 : vector<16x256xf32>
    %c0_6 = arith.constant 0 : index
    %c0_7 = arith.constant 0 : index
    %9 = vector.load %arg9[%c0_6, %c0_7] : memref<16x256xf32, #tpu.memory_space<vmem>>, vector<16x256xf32>
    tpu.vector_store %arg9[%c0_6, %c0_7], %8 {strides = array<i32>} : memref<16x256xf32, #tpu.memory_space<vmem>>, vector<16x256xf32>,
    return
  }
  func.func @transform_0(%arg0: i32, %arg1: i32) -> (i32, i32) {
    %c0_i32 = arith.constant 0 : i32
    %c0_i32_0 = arith.constant 0 : i32
    return %arg0, %c0_i32 : i32, i32
  }
  func.func @transform_1(%arg0: i32, %arg1: i32) -> (i32, i32) {
    %c0_i32 = arith.constant 0 : i32
    %c0_i32_0 = arith.constant 0 : i32
    %c0_i32_1 = arith.constant 0 : i32
    return %c0_i32, %c0_i32_0 : i32, i32
  }
  func.func @transform_2(%arg0: i32, %arg1: i32) -> (i32, i32) {
    %c0_i32 = arith.constant 0 : i32
    %c0_i32_0 = arith.constant 0 : i32
    %c0_i32_1 = arith.constant 0 : i32
    return %c0_i32, %c0_i32_0 : i32, i32
  }
  func.func @transform_3(%arg0: i32, %arg1: i32) -> (i32, i32) {
    %c0_i32 = arith.constant 0 : i32
    %c0_i32_0 = arith.constant 0 : i32
    %c0_i32_1 = arith.constant 0 : i32
    return %c0_i32, %c0_i32_0 : i32, i32
  }
  func.func @transform_4(%arg0: i32, %arg1: i32) -> (i32, i32) {
    %c0_i32 = arith.constant 0 : i32
    %c0_i32_0 = arith.constant 0 : i32
    %c0_i32_1 = arith.constant 0 : i32
    return %c0_i32, %c0_i32_0 : i32, i32
  }
  func.func @transform_5(%arg0: i32, %arg1: i32) -> (i32, i32) {
    %c0_i32 = arith.constant 0 : i32
    %c0_i32_0 = arith.constant 0 : i32
    return %c0_i32, %arg1 : i32, i32
  }
  func.func @transform_6(%arg0: i32, %arg1: i32) -> (i32, i32) {
    %c0_i32 = arith.constant 0 : i32
    %c0_i32_0 = arith.constant 0 : i32
    return %c0_i32, %arg1 : i32, i32
  }
  func.func @transform_7(%arg0: i32, %arg1: i32) -> (i32, i32) {
    %c0_i32 = arith.constant 0 : i32
    return %arg0, %arg1 : i32, i32
  }
}

</mosaic_0001>

<bundles_post_ra>
// kernel: tpu_custom_call.1
= control target key start
LH: loop header
LB: loop body
LE: loop exit
PB: predicated region body
PF: predicated region fallthrough
CT: control target
= control target key end

     0   :  { %12 = vsyncpa [#allocation4], 0  ;;  %s768_s0 = inlined_call_operand.hbm [shape: bf16[16,128], index: 0, kind: input, shape index: {}]   ;;  %s769_s1 = inlined_call_operand.hbm [shape: bf16[128,128], index: 1, kind: input, shape index: {}]   ;;  %s770_s2 = inlined_call_operand.vmem [shape: f32[1,128], index: 2, kind: input, shape index: {}]   ;;  %s771_s3 = inlined_call_operand.vmem [shape: f32[1,128], index: 3, kind: input, shape index: {}]   ;;  %s772_s4 = inlined_call_operand.vmem [shape: f32[1,128], index: 4, kind: input, shape index: {}]   ;;  %s773_s5 = inlined_call_operand.hbm [shape: bf16[128,256], index: 5, kind: input, shape index: {}]   ;;  %s774_s6 = inlined_call_operand.vmem [shape: f32[1,256], index: 6, kind: input, shape index: {}]   ;;  %s775_s7 = inlined_call_operand.hbm [shape: f32[16,256], index: 7, kind: output, shape index: {}]  }
   0x1   :  { %13 = vsyncpa [#allocation7], 0 }
   0x2   :  { %14 = vsyncpa [#allocation5], 0  ;;  %s691_s24 = smov [#allocation6]   ;;  %s692_s26 = smov [#allocation3]  }
   0x3   :  { %s32_s25 = sshll.u32 %s691_s24, 4  ;;  %s20_s27 = sshll.u32 %s692_s26, 4  ;;  %s33_s25 = int_to_ptr.vmem [resolvable:$true] %s32_s25  ;;  %s21_s27 = int_to_ptr.vmem [resolvable:$true] %s20_s27 }
   0x4   :  { %s613_s28 = scalar_lea.vmem %s33_s25, 1024  ;;  %p618_p1 = scmp.lt.s32.totalorder %s33_s25, %s33_s25 }
   0x5   :  { %p614_p0 = scmp.ne.s32.totalorder %s33_s25, %s613_s28  ;;  %p619_p2 = scmp.lt.s32.totalorder %s613_s28, %s613_s28 }
   0x7   :  { %p620_p3 = por %p619_p2, %p618_p1 }
   0x9   :  { %p621_p4 = pnand %p620_p3, %p614_p0 }
   0xb   :  { %624 = shalt.err (!%p621_p4)
}
   0xc   :  { %s693_s29 = smov 64   ;;  %s694_s30 = smov 4  }
   0xd   :  { %38 = dma.hbm_to_vmem [thread:$0]  %s769_s1, 1024, %s33_s25, [#allocation7], %s693_s29, %s693_s29, %s694_s30  }
   0xe   :  { %s633_s10 = scalar_lea.vmem %s21_s27, 128  ;;  %p638_p6 = scmp.lt.s32.totalorder %s21_s27, %s21_s27 }
   0xf   :  { %p634_p5 = scmp.ne.s32.totalorder %s21_s27, %s633_s10  ;;  %p639_p7 = scmp.lt.s32.totalorder %s633_s10, %s633_s10 }
  0x11   :  { %p640_p8 = por %p639_p7, %p638_p6 }
  0x13   :  { %p641_p9 = pnand %p640_p8, %p634_p5 }
  0x15   :  { %644 = shalt.err (!%p641_p9)
}
  0x16   :  { %26 = dma.hbm_to_vmem [thread:$0]  %s768_s0, 128, %s21_s27, [#allocation4], %s693_s29, %s693_s29, %s694_s30  }
  0x17   :  { %s695_s13 = smov [#allocation8]  }
  0x18   :  { %s50_s14 = sshll.u32 %s695_s13, 4  ;;  %s51_s14 = int_to_ptr.vmem [resolvable:$true] %s50_s14 }
  0x19   :  { %s653_s15 = scalar_lea.vmem %s51_s14, 2048  ;;  %p658_p11 = scmp.lt.s32.totalorder %s51_s14, %s51_s14 }
  0x1a   :  { %p654_p10 = scmp.ne.s32.totalorder %s51_s14, %s653_s15  ;;  %p659_p12 = scmp.lt.s32.totalorder %s653_s15, %s653_s15 }
  0x1c   :  { %p660_p13 = por %p659_p12, %p658_p11 }
  0x1e   :  { %p661_p0 = pnand %p660_p13, %p654_p10 }
  0x20   :  { %664 = shalt.err (!%p661_p0)
}
  0x21   :  { %s696_s1 = smov 128   ;;  %s697_s16 = smov 8  }
  0x22   :  { %56 = dma.hbm_to_vmem [thread:$0]  %s773_s5, 2048, %s51_s14, [#allocation7], %s696_s1, %s696_s1, %s697_s16  }
  0x23   :  { %685 = dma.done.wait [#allocation4], 128  }
  0x24   :  { %686 = vsyncadd [#allocation4], 4294967168 }
  0x25   :  { %687 = dma.done.wait [#allocation7], 3072  }
  0x26   :  { %688 = vsyncadd [#allocation7], 4294964224  ;;  %v698_v0 = vmov 0.0   ;;  %vm699_vm0 = vmmov 0   ;;  %v559_v1 = vld [vmem:[#allocation6 + $0x38] sm:$0xff]   ;;  %v560_v2 = vld [vmem:[#allocation6 + $0x30] sm:$0xff]  }
  0x27   :  { %526 = vmatprep.subr.bf16.mxu0 %v698_v0  ;;  %542 = vmatprep.mubr.msk.bf16.mxu0 %vm699_vm0, %v698_v0  ;;  %v561_v3 = vld [vmem:[#allocation6 + $0x28] sm:$0xff]   ;;  %v562_v4 = vld [vmem:[#allocation6 + $0x20] sm:$0xff]   ;;  %v563_v5 = vld [vmem:[#allocation6 + $0x18] sm:$0xff]  }
  0x28   :  { %527 = vmatpush3.bf16.msra.mxu0 %v559_v1  ;;  %v564_v6 = vld [vmem:[#allocation6 + $0x10] sm:$0xff]   ;;  %v565_v7 = vld [vmem:[#allocation6 + $0x8] sm:$0xff]   ;;  %v566_v8 = vld [vmem:[#allocation6] sm:$0xff]  }
  0x29   :  { %528 = vmatprep.subr.bf16.mxu0 %v698_v0  ;;  %v567_v9 = vld [vmem:[#allocation3] sm:$0xff]   ;;  %v479_v10 = vld [vmem:[%s770_s2] ss:$0 sm:$0xff] }
  0x2c   :  { %529 = vmatpush3.bf16.msra.mxu0 %v560_v2 }
  0x2d   :  { %530 = vmatprep.subr.bf16.mxu0 %v698_v0 }
  0x30   :  { %531 = vmatpush3.bf16.msra.mxu0 %v561_v3 }
  0x31   :  { %532 = vmatprep.subr.bf16.mxu0 %v698_v0 }
  0x34   :  { %533 = vmatpush3.bf16.msra.mxu0 %v562_v4 }
  0x35   :  { %534 = vmatprep.subr.bf16.mxu0 %v698_v0 }
  0x38   :  { %535 = vmatpush3.bf16.msra.mxu0 %v563_v5 }
  0x39   :  { %536 = vmatprep.subr.bf16.mxu0 %v698_v0 }
  0x3c   :  { %537 = vmatpush3.bf16.msra.mxu0 %v564_v6 }
  0x3d   :  { %538 = vmatprep.subr.bf16.mxu0 %v698_v0 }
  0x40   :  { %539 = vmatpush3.bf16.msra.mxu0 %v565_v7 }
  0x41   :  { %540 = vmatprep.subr.bf16.mxu0 %v698_v0 }
  0x44   :  { %541 = vmatpush3.bf16.msra.mxu0 %v566_v8 }
  0x47   :  { %543 = vmatmul.mubr.bf16.vlgmr.msra.gmra.mxu0 %v567_v9 }
 0x107   :  { %v186_v11 = vpop.f32.mrf.mxu0 }
 0x108   :  { %v187_v12 = vadd.f32 %v479_v10, %v186_v11  ;;  %v568_v11 = vld [vmem:[#allocation8 + $0x74] ss:$8 sps:$4 sm:$0xff]  }
 0x109   :  { %v544_v13 = vpop.f32.mrf.mxu0  ;;  %414 = vmatprep.subr.bf16.mxu1 %v568_v11 }
 0x10a   :  { %v195_v14 = vmul.f32 0.70710677, %v187_v12  ;;  %v193_v59 = vmul.f32 0.5, %v187_v12  ;;  %v570_v12 = vld [vmem:[#allocation8 + $0x70] ss:$8 sps:$4 sm:$0xff]  }
 0x10b   :  { %v189_v15 = vpop.f32.mrf.mxu0  ;;  %415 = vmatpush1.bf16.msra.mxu1 %v570_v12  ;;  %v571_v13 = vld [vmem:[#allocation8 + $0x64] ss:$8 sps:$4 sm:$0xff]  }
 0x10c   :  { %v197_v16 = vand.u32 2147483647, %v195_v14  ;;  %v190_v17 = vadd.f32 %v479_v10, %v189_v15  ;;  %vm237_vm1 = vcmp.ge.f32.partialorder %v195_v14, 0.0  ;;  %v573_v14 = vld [vmem:[#allocation8 + $0x60] ss:$8 sps:$4 sm:$0xff]   ;;  %416 = vmatprep.subr.bf16.mxu1 %v571_v13 }
 0x10d   :  { %v545_v18 = vpop.f32.mrf.mxu0  ;;  %v574_v15 = vld [vmem:[#allocation8 + $0x54] ss:$8 sps:$4 sm:$0xff]  }
 0x10e   :  { %v199_v19 = vmul.f32 0.3275911, %v197_v16  ;;  %v196_v20 = vmul.f32 0.70710677, %v190_v17  ;;  %v225_v25 = vmul.f32 %v197_v16, %v197_v16  ;;  %v194_v0 = vmul.f32 0.5, %v190_v17 }
 0x10f   :  { %417 = vmatpush1.bf16.msra.mxu1 %v573_v14  ;;  %v576_v16 = vld [vmem:[#allocation8 + $0x50] ss:$8 sps:$4 sm:$0xff]   ;;  %v577_v17 = vld [vmem:[#allocation8 + $0x44] ss:$8 sps:$4 sm:$0xff]   ;;  %v579_v18 = vld [vmem:[#allocation8 + $0x40] ss:$8 sps:$4 sm:$0xff]  }
 0x110   :  { %v201_v21 = vadd.f32 1.0, %v199_v19  ;;  %v198_v22 = vand.u32 2147483647, %v196_v20  ;;  %v227_v26 = vsub.f32 0.0, %v225_v25  ;;  %vm238_vm2 = vcmp.ge.f32.partialorder %v196_v20, 0.0  ;;  %418 = vmatprep.subr.bf16.mxu1 %v574_v15 }
 0x111   :  { %v580_v19 = vld [vmem:[#allocation8 + $0x34] ss:$8 sps:$4 sm:$0xff]   ;;  %v582_v20 = vld [vmem:[#allocation8 + $0x30] ss:$8 sps:$4 sm:$0xff]   ;;  %v589_v25 = vld [vmem:[#allocation8 + $0x4] ss:$8 sps:$4 sm:$0xff]  }
 0x112   :  { %593 = vrcp.f32 %v201_v21  ;;  %v200_v23 = vmul.f32 0.3275911, %v198_v22  ;;  %v226_v27 = vmul.f32 %v198_v22, %v198_v22  ;;  %v229_v29 = vmul.f32 1.442695, %v227_v26  ;;  %v583_v21 = vld [vmem:[#allocation8 + $0x24] ss:$8 sps:$4 sm:$0xff]  }
 0x113   :  { %419 = vmatpush1.bf16.msra.mxu1 %v576_v16  ;;  %v585_v22 = vld [vmem:[#allocation8 + $0x20] ss:$8 sps:$4 sm:$0xff]  }
 0x114   :  { %v202_v24 = vadd.f32 1.0, %v200_v23  ;;  %v228_v30 = vsub.f32 0.0, %v226_v27  ;;  %420 = vmatprep.subr.bf16.mxu1 %v577_v17  ;;  %v586_v23 = vld [vmem:[#allocation8 + $0x14] ss:$8 sps:$4 sm:$0xff]   ;;  %v591_v26 = vld [vmem:[#allocation8] ss:$8 sps:$4 sm:$0xff]  }
 0x115   :  { %v700_v27 = vmov 0  }
 0x116   :  { %595 = vrcp.f32 %v202_v24  ;;  %v231_v34 = vmul.f32 1.442695, %v228_v30  ;;  %v588_v24 = vld [vmem:[#allocation8 + $0x10] ss:$8 sps:$4 sm:$0xff]   ;;  %446 = vmatprep.mubr.bf16.mxu1 %v700_v27 }
 0x117   :  { %597 = vpow2.f32 %v229_v29  ;;  %421 = vmatpush1.bf16.msra.mxu1 %v579_v18 }
 0x118   :  { %599 = vpow2.f32 %v231_v34  ;;  %422 = vmatprep.subr.bf16.mxu1 %v580_v19 }
 0x11b   :  { %423 = vmatpush1.bf16.msra.mxu1 %v582_v20 }
 0x11c   :  { %424 = vmatprep.subr.bf16.mxu1 %v583_v21 }
 0x11f   :  { %v594_v28 = vpop.eup %593  ;;  %425 = vmatpush1.bf16.msra.mxu1 %v585_v22 }
 0x120   :  { %v207_v31 = vmul.f32 1.0614054, %v594_v28  ;;  %426 = vmatprep.subr.bf16.mxu1 %v586_v23 }
 0x122   :  { %v209_v32 = vadd.f32 -1.4531521, %v207_v31 }
 0x123   :  { %v596_v33 = vpop.eup %595  ;;  %427 = vmatpush1.bf16.msra.mxu1 %v588_v24 }
 0x124   :  { %v211_v35 = vmul.f32 %v594_v28, %v209_v32  ;;  %v208_v36 = vmul.f32 1.0614054, %v596_v33  ;;  %v598_v49 = vpop.eup %597  ;;  %428 = vmatprep.subr.bf16.mxu1 %v589_v25 }
 0x125   :  { %v600_v54 = vpop.eup %599 }
 0x126   :  { %v213_v37 = vadd.f32 1.4214138, %v211_v35  ;;  %v210_v38 = vadd.f32 -1.4531521, %v208_v36  ;;  %v489_v36 = vld [vmem:[%s771_s3] ss:$0 sm:$0xff] }
 0x127   :  { %429 = vmatpush1.bf16.msra.mxu1 %v591_v26  ;;  %s701_s3 = smov [#allocation9]  }
 0x128   :  { %v215_v39 = vmul.f32 %v594_v28, %v213_v37  ;;  %v212_v40 = vmul.f32 %v596_v33, %v210_v38 }
 0x12a   :  { %v217_v41 = vadd.f32 -0.28449672, %v215_v39  ;;  %v214_v42 = vadd.f32 1.4214138, %v212_v40  ;;  %v490_v40 = vld [vmem:[%s772_s4] ss:$0 sm:$0xff] }
 0x12b   :  { %s466_s4 = sshll.u32 %s701_s3, 4  ;;  %s467_s4 = int_to_ptr.vmem [resolvable:$true] %s466_s4 }
 0x12c   :  { %v219_v43 = vmul.f32 %v594_v28, %v217_v41  ;;  %v216_v44 = vmul.f32 %v596_v33, %v214_v42  ;;  %s665_s24 = scalar_lea.vmem %s467_s4, 512  ;;  %p670_p2 = scmp.lt.s32.totalorder %s467_s4, %s467_s4 }
 0x12d   :  { %p666_p1 = scmp.ne.s32.totalorder %s467_s4, %s665_s24  ;;  %p671_p3 = scmp.lt.s32.totalorder %s665_s24, %s665_s24 }
 0x12e   :  { %v221_v45 = vadd.f32 0.2548296, %v219_v43  ;;  %v218_v46 = vadd.f32 -0.28449672, %v216_v44 }
 0x12f   :  { %p672_p4 = por %p671_p3, %p670_p2 }
 0x130   :  { %v223_v47 = vmul.f32 %v594_v28, %v221_v45  ;;  %v220_v48 = vmul.f32 %v596_v33, %v218_v46  ;;  %v318_v46 = vlaneseq }
 0x131   :  { %p673_p5 = pnand %p672_p4, %p666_p1 }
 0x132   :  { %v233_v50 = vmul.f32 %v598_v49, %v223_v47  ;;  %v222_v51 = vadd.f32 0.2548296, %v220_v48  ;;  %v319_v47 = vshrl.u32 %v318_v46, 7  ;;  %v316_v49 = vld [vmem:[%s774_s6] sm:$0x3] }
 0x134   :  { %v235_v52 = vsub.f32 1.0, %v233_v50  ;;  %v224_v53 = vmul.f32 %v596_v33, %v222_v51  ;;  %v320_v48 = vsub.s32 0, %v319_v47  ;;  %v324_v50 = vsub.s32 1, %v319_v47 }
 0x136   :  { %v239_v55 = vsub.f32 0.0, %v235_v52  ;;  %v234_v56 = vmul.f32 %v600_v54, %v224_v53  ;;  %v321_v51 = vrot.slane %v316_v49, %v320_v48 }
 0x138   :  { %v241_v57 = vsel %vm237_vm1, %v235_v52, %v239_v55  ;;  %v236_v58 = vsub.f32 1.0, %v234_v56  ;;  %v325_v52 = vrot.slane %v316_v49, %v324_v50 }
 0x139   :  { %v243_v60 = vadd.f32 1.0, %v241_v57 }
 0x13a   :  { %v240_v61 = vsub.f32 0.0, %v236_v58 }
 0x13b   :  { %v245_v62 = vmul.f32 %v243_v60, %v193_v59 }
 0x13c   :  { %v242_v63 = vsel %vm238_vm2, %v236_v58, %v240_v61 }
 0x13d   :  { %247 = vadd.xlane.f32.xlu0 %v245_v62  ;;  %v244_v1 = vadd.f32 1.0, %v242_v63 }
 0x13f   :  { %v246_v2 = vmul.f32 %v244_v1, %v194_v0 }
 0x141   :  { %249 = vadd.xlane.f32.xlu0 %v246_v2 }
 0x1c6   :  { %v248_v3 = vpop.xlane.xlu0 %247 }
 0x1c7   :  { %v252_v4 = vmul.f32 0.0078125, %v248_v3 }
 0x1c9   :  { %v254_v5 = vsub.f32 %v245_v62, %v252_v4 }
 0x1ca   :  { %v250_v6 = vpop.xlane.xlu0 %249 }
 0x1cb   :  { %v253_v7 = vmul.f32 0.0078125, %v250_v6  ;;  %v256_v8 = vmul.f32 %v254_v5, %v254_v5 }
 0x1cd   :  { %v255_v9 = vsub.f32 %v246_v2, %v253_v7  ;;  %258 = vadd.xlane.f32.xlu1 %v256_v8 }
 0x1cf   :  { %v257_v10 = vmul.f32 %v255_v9, %v255_v9 }
 0x1d1   :  { %260 = vadd.xlane.f32.xlu1 %v257_v10 }
 0x256   :  { %v259_v28 = vpop.xlane.xlu1 %258 }
 0x257   :  { %v262_v29 = vmul.f32 0.0078125, %v259_v28 }
 0x259   :  { %v264_v30 = vadd.f32 1e-12, %v262_v29 }
 0x25a   :  { %v261_v31 = vpop.xlane.xlu1 %260 }
 0x25b   :  { %601 = vrsqrt.f32 %v264_v30  ;;  %v263_v32 = vmul.f32 0.0078125, %v261_v31 }
 0x25d   :  { %v265_v33 = vadd.f32 1e-12, %v263_v32 }
 0x25f   :  { %603 = vrsqrt.f32 %v265_v33 }
 0x268   :  { %v602_v34 = vpop.eup %601 }
 0x269   :  { %v268_v35 = vmul.f32 %v602_v34, %v254_v5 }
 0x26b   :  { %v277_v38 = vmul.f32 %v489_v36, %v268_v35 }
 0x26c   :  { %v604_v37 = vpop.eup %603 }
 0x26d   :  { %v269_v39 = vmul.f32 %v604_v37, %v255_v9  ;;  %v286_v42 = vadd.f32 %v490_v40, %v277_v38 }
 0x26f   :  { %v278_v41 = vmul.f32 %v489_v36, %v269_v39 }
 0x271   :  { %v287_v43 = vadd.f32 %v490_v40, %v278_v41 }
 0x273   :  { %v515_v44 = vpack.c.bf16 %v287_v43, %v286_v42 }
 0x275   :  { %516 = vst [vmem:[#allocation2] sm:$0xff] %v515_v44  }
 0x27c   :  { %v592_v45 = vld [vmem:[#allocation2] sm:$0xff]  }
 0x27d   :  { %447 = vmatmul.mubr.bf16.vlgmr.msra.gmra.mxu1 %v592_v45 }
 0x33d   :  { %v448_v53 = vpop.f32.mrf.mxu1 }
 0x33e   :  { %v449_v54 = vadd.f32 %v448_v53, %v321_v51 }
 0x33f   :  { %v450_v55 = vpop.f32.mrf.mxu1 }
 0x340   :  { %457 = vst [vmem:[#allocation9] sm:$0xff] %v449_v54  ;;  %v451_v56 = vadd.f32 %v450_v55, %v325_v52 }
 0x341   :  { %v452_v57 = vpop.f32.mrf.mxu1 }
 0x342   :  { %458 = vst [vmem:[#allocation9 + $0x8] sm:$0xff] %v451_v56  ;;  %v453_v58 = vadd.f32 %v452_v57, %v321_v51 }
 0x343   :  { %v454_v59 = vpop.f32.mrf.mxu1 }
 0x344   :  { %459 = vst [vmem:[#allocation9 + $0x10] sm:$0xff] %v453_v58  ;;  %v455_v60 = vadd.f32 %v454_v59, %v325_v52 }
 0x346   :  { %460 = vst [vmem:[#allocation9 + $0x18] sm:$0xff] %v455_v60 }
 0x347   :  { %676 = shalt.err (!%p673_p5)
}
 0x348   :  { %s702_s6 = smov 256   ;;  %s703_s25 = smov 16  }
 0x349   :  { %472 = dma.vmem_to_hbm [thread:$0]  %s467_s4, 512, %s775_s7, [#allocation5], %s702_s6, %s702_s6, %s703_s25  }
 0x34a   :  { %689 = dma.done.wait [#allocation5], 512  }
 0x34b   :  { %690 = vsyncadd [#allocation5], 4294966784 }
 0x34c   :  { %476 = vsyncpa [#allocation4], 1 }
 0x34d   :  { %477 = vsyncpa [#allocation7], 1 }
 0x34e   :  { %478 = vsyncpa [#allocation5], 1 }

</bundles_post_ra>
